<compile_context>
chip_gen: v7x
topology: tpu7x:2x2x1
jax: 0.10.0
libtpu: 0.0.40
codegen_flags: <defaults>
</compile_context>

<pallas_src>
import functools

import numpy as np
import jax
import jax.numpy as jnp
from jax.experimental import pallas as pl
from jax.experimental.pallas import tpu as pltpu


# -----------------------------------------------------------------------------
# Fused conv-chain Pallas kernel
# -----------------------------------------------------------------------------
def _fused_conv_chain_kernel(*refs, H, n_stages):
    """n_stages of Conv3x3(SAME)+bias+ReLU on a block of Bt whole images.

    refs layout (set up by fused_conv_chain_nchw):
      refs[0]                    x_ref (Bt*H, W*C_in)        bf16, lane-packed rows
      refs[1 + 2i], refs[2 + 2i] w_i   (3, W*C_i, W*C_{i+1}) bf16 banded weights
                                 b_i   (1, W*C_{i+1})        f32 lane-tiled bias
      refs[1 + 2*n_stages]       o_ref (Bt*H, W*C_out)       lane-dense output
    """
    x_ref = refs[0]
    w_refs = refs[1:1 + 2 * n_stages:2]
    b_refs = refs[2:2 + 2 * n_stages:2]
    o_ref = refs[1 + 2 * n_stages]

    M = x_ref.shape[0]                      # Bt * H rows (batch folded into M)

    # Per-image vertical SAME-padding masks; computed once, reused by every stage.
    row_in_img = jax.lax.broadcasted_iota(jnp.int32, (M, 1), 0) % H
    top_mask = (row_in_img != 0).astype(jnp.float32)      # kills x[h-1] at image top
    bot_mask = (row_in_img != H - 1).astype(jnp.float32)  # kills x[h+1] at image bottom

    cur = x_ref[...]                        # bf16 (M, W*C_in)
    for i in range(n_stages):
        w = w_refs[i]
        # One lane-dense MXU matmul per vertical tap (kh = 0,1,2).  Horizontal
        # taps and SAME column padding are baked into the banded weights, so
        # K = W*Cin and N = W*Cout with M = Bt*H rows feeding the MXU.
        p0 = jnp.dot(cur, w[0], preferred_element_type=jnp.float32)
        p1 = jnp.dot(cur, w[1], preferred_element_type=jnp.float32)
        p2 = jnp.dot(cur, w[2], preferred_element_type=jnp.float32)
        # Vertical taps via sublane rolls (XLU slot, overlaps MXU) + boundary
        # masks: no padded VMEM intermediate, no re-zeroing, no unaligned stores.
        acc = (p1
               + top_mask * pltpu.roll(p0, 1, 0)          # p0[h-1]
               + bot_mask * pltpu.roll(p2, M - 1, 0))     # p2[h+1]
        y = jnp.maximum(acc + b_refs[i][...], 0.0)        # bias + ReLU in f32

        if i + 1 < n_stages:
            cur = y.astype(jnp.bfloat16)    # intermediate named feat stays in vregs
        else:
            o_ref[...] = y.astype(o_ref.dtype)            # lane-dense store


# -----------------------------------------------------------------------------
# Host-side parameter preparation
# -----------------------------------------------------------------------------
def _banded_conv_weights(w_oihw, W, dtype):
    """OIHW (Cout, Cin, 3, 3) conv weights -> (3, W*Cin, W*Cout) banded matrices.

    band[kh][iw*Cin + ci, ow*Cout + co] = w[co, ci, kh, kw] where iw = ow + kw - 1
    (entries with iw outside [0, W) stay zero: SAME column padding baked in).
    """
    w = np.asarray(jax.device_get(w_oihw), dtype=np.float32)
    Cout, Cin, KH, KW = w.shape
    assert (KH, KW) == (3, 3), "FusedConvChain expects 3x3 kernels"
    band = np.zeros((KH, W * Cin, W * Cout), dtype=np.float32)
    for kh in range(KH):
        for kw in range(KW):
            tap = w[:, :, kh, kw].T                       # (Cin, Cout)
            for ow in range(W):
                iw = ow + kw - 1
                if 0 <= iw < W:
                    band[kh, iw * Cin:(iw + 1) * Cin,
                         ow * Cout:(ow + 1) * Cout] = tap
    return jnp.asarray(band, dtype=dtype)


def _lane_tiled_bias(bias, W):
    return jnp.tile(jnp.asarray(bias, dtype=jnp.float32), W).reshape(1, -1)


# -----------------------------------------------------------------------------
# Wrapper: chain of Conv3x3(SAME)+bias+ReLU stages as ONE pallas_call
# -----------------------------------------------------------------------------
def fused_conv_chain_nchw(x_nchw, stages, *, target_rows=256):
    """x_nchw: (B, C_in, H, W) like PyTorch. stages: list of (w_oihw, bias)."""
    B, C_in, H, W = x_nchw.shape
    n_stages = len(stages)
    cins = [C_in] + [int(w.shape[0]) for (w, _) in stages[:-1]]
    couts = [int(w.shape[0]) for (w, _) in stages]
    C_out = couts[-1]

    # Batch tile: fold as many whole images into M as fills the MXU (~256 rows),
    # giving the smallest grid that still keeps blocks VMEM-friendly.
    max_bt = max(1, target_rows // H)
    cands = [d for d in range(1, B + 1)
             if B % d == 0 and d <= max_bt and (d == B or (d * H) % 8 == 0)]
    Bt = max(cands) if cands else B
    num_blocks = B // Bt
    M = Bt * H

    # One-time boundary glue for the whole pipeline: NCHW -> lane-packed rows
    # (B*H, W*C_in), fused with the bf16 cast.  No height padding (handled
    # in-kernel with rolls), so input HBM traffic is the bare tensor.
    x_packed = (jnp.transpose(x_nchw, (0, 2, 3, 1))
                .reshape(B * H, W * C_in)
                .astype(jnp.bfloat16))

    # Banded bf16 weights + lane-tiled f32 biases (grid-invariant blocks).
    # TODO(synk): for large W / channels, tile N (= Wt*Cout) of the banded
    # weights and single-buffer them (pl.Buffered) to respect v7x's 64 MiB VMEM.
    params = []
    in_specs = [pl.BlockSpec((M, W * C_in), lambda i: (i, 0))]
    for (w_oihw, bias), ci, co in zip(stages, cins, couts):
        params.append(_banded_conv_weights(w_oihw, W, jnp.bfloat16))  # (3, W*ci, W*co)
        params.append(_lane_tiled_bias(bias, W))                      # (1, W*co)
        in_specs.append(pl.BlockSpec((3, W * ci, W * co), lambda i: (0, 0, 0)))
        in_specs.append(pl.BlockSpec((1, W * co), lambda i: (0, 0)))

    flops = 2 * B * H * sum(3 * (W * ci) * (W * co)
                            for ci, co in zip(cins, couts))
    bytes_accessed = (2 * int(x_packed.size)
                      + sum(int(p.size) * int(p.dtype.itemsize) for p in params)
                      + 4 * B * H * W * C_out)

    out_packed = pl.pallas_call(
        functools.partial(_fused_conv_chain_kernel, H=H, n_stages=n_stages),
        out_shape=jax.ShapeDtypeStruct((B * H, W * C_out), x_nchw.dtype),
        grid_spec=pltpu.PrefetchScalarGridSpec(
            num_scalar_prefetch=0,
            grid=(num_blocks,),          # 1 step at demo sizes (no per-step tax)
            in_specs=in_specs,
            out_specs=pl.BlockSpec((M, W * C_out), lambda i: (i, 0)),
        ),
        compiler_params=pltpu.CompilerParams(
            dimension_semantics=("parallel",)),   # batch blocks -> megacore on v7x
        cost_estimate=pl.CostEstimate(
            flops=flops, transcendentals=0, bytes_accessed=int(bytes_accessed)),
    )(x_packed, *params)

    # Boundary glue out (once per pipeline): lane-packed -> NCHW.
    return jnp.transpose(out_packed.reshape(B, H, W, C_out), (0, 3, 1, 2))


# -----------------------------------------------------------------------------
# GBody (faithful port of the vedastr routing) + synthetic component registry
# -----------------------------------------------------------------------------
class FusedConvChain:
    """Consecutive Conv3x3(pad=1)+bias+ReLU components fused into one Pallas
    kernel; intermediate named features never leave the chip."""

    def __init__(self, from_layer, to_layer, stages):
        self.from_layer = from_layer
        self.to_layer = to_layer
        self.stages = [(jnp.asarray(w), jnp.asarray(b)) for (w, b) in stages]

    def __call__(self, x):
        return fused_conv_chain_nchw(x, self.stages)


class CollectBlock:
    """Stand-in for a vedastr CollectBlock: picks one named feature."""

    def __init__(self, from_layer):
        self.from_layer = from_layer

    def __call__(self, feats):
        return feats[self.from_layer]


# TODO(synk): only the Conv3x3+ReLU chain and CollectBlock component types of
# the config-driven vedastr registries are implemented here.
_COMPONENTS = {'FusedConvChain': FusedConvChain}
_BRICKS = {'CollectBlock': CollectBlock}


def build_component(cfg):
    cfg = dict(cfg)
    return _COMPONENTS[cfg.pop('type')](**cfg)


def build_brick(cfg):
    cfg = dict(cfg)
    return _BRICKS[cfg.pop('type')](**cfg)


class GBody:
    """Faithful port of GBody.forward routing semantics (dict of named feats)."""

    def __init__(self, pipelines, collect=None):
        self.input_to_layer = 'input'
        self.components = [build_component(cfg) for cfg in pipelines]
        if collect is not None:
            self.collect = build_brick(collect)

    @property
    def with_collect(self):
        return hasattr(self, 'collect') and self.collect is not None

    def forward(self, x):
        feats = {self.input_to_layer: x}
        for component in self.components:
            component_from = component.from_layer
            component_to = component.to_layer
            out = component(feats[component_from])
            feats[component_to] = out
        if self.with_collect:
            return self.collect(feats)
        else:
            return feats

    __call__ = forward


# -----------------------------------------------------------------------------
# Reference + demo
# -----------------------------------------------------------------------------
def _reference_conv_relu(x_nchw, w_oihw, bias):
    y = jax.lax.conv_general_dilated(
        x_nchw, w_oihw, window_strides=(1, 1), padding='SAME',
        dimension_numbers=('NCHW', 'OIHW', 'NCHW'))
    y = y + bias[None, :, None, None]
    return jnp.maximum(y, 0.0)


if __name__ == "__main__":
    key = jax.random.PRNGKey(0)
    k_x, k_w1, k_b1, k_w2, k_b2 = jax.random.split(key, 5)

    B, C0, H, W = 2, 4, 16, 16
    C1, C2 = 8, 16

    x = jax.random.normal(k_x, (B, C0, H, W), dtype=jnp.float32)

    # Deterministic synthetic parameters (conv weights OIHW, biases).
    w1 = jax.random.normal(k_w1, (C1, C0, 3, 3), dtype=jnp.float32) * 0.1
    b1 = jax.random.normal(k_b1, (C1,), dtype=jnp.float32) * 0.1
    w2 = jax.random.normal(k_w2, (C2, C1, 3, 3), dtype=jnp.float32) * 0.1
    b2 = jax.random.normal(k_b2, (C2,), dtype=jnp.float32) * 0.1

    # Config-driven construction, mirroring vedastr.  The two conv stages
    # ('input' -> 'c1' -> 'c2') are fused into one component; the externally
    # observable pipeline output (collect of 'c2') is unchanged.
    pipelines = [dict(type='FusedConvChain', from_layer='input', to_layer='c2',
                      stages=[(w1, b1), (w2, b2)])]
    collect_cfg = dict(type='CollectBlock', from_layer='c2')
    body = GBody(pipelines, collect=collect_cfg)

    out = jax.block_until_ready(body(x))

    # Pure-JAX f32 reference of the whole pipeline.  Kernel matmuls run on the
    # MXU in bf16 (f32 accumulate), so tolerances are loosened accordingly.
    ref_c1 = _reference_conv_relu(x, w1, b1)
    ref_c2 = _reference_conv_relu(ref_c1, w2, b2)
    assert out.shape == (B, C2, H, W), out.shape
    assert jnp.allclose(out, ref_c2, atol=5e-2, rtol=5e-2), "mismatch vs reference"

    print("KERNEL_OK")
</pallas_src>

<mosaic_0001>
module attributes {stable_mosaic.version = 11 : i64} {
  func.func @_fused_conv_chain_kernel(%arg0: i32, %arg1: memref<32x64xbf16, #tpu.memory_space<vmem>>, %arg2: memref<3x64x128xbf16, #tpu.memory_space<vmem>>, %arg3: memref<1x128xf32, #tpu.memory_space<vmem>>, %arg4: memref<3x128x256xbf16, #tpu.memory_space<vmem>>, %arg5: memref<1x256xf32, #tpu.memory_space<vmem>>, %arg6: memref<32x256xf32, #tpu.memory_space<vmem>>) attributes {dimension_semantics = [#tpu.dimension_semantics<parallel>], iteration_bounds = array<i64: 1>, scalar_prefetch = 0 : i64, scratch_operands = 0 : i64, tpu.core_type = #tpu.core_type<tc>, window_params = [{transform_indices = @transform_0, window_bounds = array<i64: 32, 64>}, {pipeline_mode = #tpu.pipeline_mode<synchronous>, transform_indices = @transform_1, window_bounds = array<i64: 3, 64, 128>}, {pipeline_mode = #tpu.pipeline_mode<synchronous>, transform_indices = @transform_2, window_bounds = array<i64: 1, 128>}, {pipeline_mode = #tpu.pipeline_mode<synchronous>, transform_indices = @transform_3, window_bounds = array<i64: 3, 128, 256>}, {pipeline_mode = #tpu.pipeline_mode<synchronous>, transform_indices = @transform_4, window_bounds = array<i64: 1, 256>}, {transform_indices = @transform_5, window_bounds = array<i64: 32, 256>}]} {
    %0 = tpu.iota {dimensions = array<i32: 0>} : vector<32x1xi32>
    %c16_i32 = arith.constant 16 : i32
    %c0_i32 = arith.constant 0 : i32
    %1 = arith.cmpi eq, %c16_i32, %c0_i32 : i32
    %c1_i32 = arith.constant 1 : i32
    %2 = arith.select %1, %c1_i32, %c16_i32 : i32
    %3 = vector.broadcast %2 : i32 to vector<32x1xi32>
    %4 = arith.remsi %0, %3 : vector<32x1xi32>
    %c0_i32_0 = arith.constant 0 : i32
    %5 = vector.broadcast %c0_i32_0 : i32 to vector<32x1xi32>
    %6 = arith.cmpi ne, %4, %5 : vector<32x1xi32>
    %c0_i32_1 = arith.constant 0 : i32
    %7 = vector.broadcast %c0_i32_1 : i32 to vector<32x1xi32>
    %8 = arith.cmpi slt, %4, %7 : vector<32x1xi32>
    %c0_i32_2 = arith.constant 0 : i32
    %9 = arith.cmpi slt, %2, %c0_i32_2 : i32
    %10 = vector.broadcast %9 : i1 to vector<32x1xi1>
    %11 = vector.broadcast %10 : vector<32x1xi1> to vector<32x1xi1>
    %12 = arith.xori %8, %11 : vector<32x1xi1>
    %13 = arith.andi %12, %6 : vector<32x1xi1>
    %14 = vector.broadcast %2 : i32 to vector<32x1xi32>
    %15 = arith.addi %4, %14 : vector<32x1xi32>
    %16 = arith.select %13, %15, %4 : vector<32x1xi1>, vector<32x1xi32>
    %c0_i32_3 = arith.constant 0 : i32
    %17 = vector.broadcast %c0_i32_3 : i32 to vector<32x1xi32>
    %18 = arith.cmpi ne, %16, %17 : vector<32x1xi32>
    %19 = arith.extui %18 : vector<32x1xi1> to vector<32x1xi32>
    %20 = arith.sitofp %19 : vector<32x1xi32> to vector<32x1xf32>
    %c15_i32 = arith.constant 15 : i32
    %21 = vector.broadcast %c15_i32 : i32 to vector<32x1xi32>
    %22 = arith.cmpi ne, %16, %21 : vector<32x1xi32>
    %23 = arith.extui %22 : vector<32x1xi1> to vector<32x1xi32>
    %24 = arith.sitofp %23 : vector<32x1xi32> to vector<32x1xf32>
    %c0 = arith.constant 0 : index
    %c0_4 = arith.constant 0 : index
    %25 = vector.load %arg1[%c0, %c0_4] : memref<32x64xbf16, #tpu.memory_space<vmem>>, vector<32x64xbf16>
    %c0_5 = arith.constant 0 : index
    %c0_6 = arith.constant 0 : index
    %c0_7 = arith.constant 0 : index
    %26 = vector.load %arg2[%c0_5, %c0_6, %c0_7] : memref<3x64x128xbf16, #tpu.memory_space<vmem>>, vector<1x64x128xbf16>
    %27 = vector.shape_cast %26 : vector<1x64x128xbf16> to vector<64x128xbf16>
    %cst = arith.constant dense<0.000000e+00> : vector<32x128xf32>
    %28 = tpu.matmul %25, %27, %cst {dimension_numbers = #tpu.dot_dimension_numbers<[1], [0], [0], [1], [0, 0, 1, 1], [], []>} : vector<32x64xbf16>, vector<64x128xbf16>, vector<32x128xf32> -> vector<32x128xf32>
    %c1 = arith.constant 1 : index
    %c0_8 = arith.constant 0 : index
    %c0_9 = arith.constant 0 : index
    %29 = vector.load %arg2[%c1, %c0_8, %c0_9] : memref<3x64x128xbf16, #tpu.memory_space<vmem>>, vector<1x64x128xbf16>
    %30 = vector.shape_cast %29 : vector<1x64x128xbf16> to vector<64x128xbf16>
    %cst_10 = arith.constant dense<0.000000e+00> : vector<32x128xf32>
    %31 = tpu.matmul %25, %30, %cst_10 {dimension_numbers = #tpu.dot_dimension_numbers<[1], [0], [0], [1], [0, 0, 1, 1], [], []>} : vector<32x64xbf16>, vector<64x128xbf16>, vector<32x128xf32> -> vector<32x128xf32>
    %c2 = arith.constant 2 : index
    %c0_11 = arith.constant 0 : index
    %c0_12 = arith.constant 0 : index
    %32 = vector.load %arg2[%c2, %c0_11, %c0_12] : memref<3x64x128xbf16, #tpu.memory_space<vmem>>, vector<1x64x128xbf16>
    %33 = vector.shape_cast %32 : vector<1x64x128xbf16> to vector<64x128xbf16>
    %cst_13 = arith.constant dense<0.000000e+00> : vector<32x128xf32>
    %34 = tpu.matmul %25, %33, %cst_13 {dimension_numbers = #tpu.dot_dimension_numbers<[1], [0], [0], [1], [0, 0, 1, 1], [], []>} : vector<32x64xbf16>, vector<64x128xbf16>, vector<32x128xf32> -> vector<32x128xf32>
    %c1_i32_14 = arith.constant 1 : i32
    %35 = tpu.dynamic_rotate %28 by %c1_i32_14 dim 0 : vector<32x128xf32>, i32 -> vector<32x128xf32>
    %36 = vector.broadcast %20 : vector<32x1xf32> to vector<32x128xf32>
    %37 = arith.mulf %36, %35 : vector<32x128xf32>
    %38 = arith.addf %31, %37 : vector<32x128xf32>
    %c31_i32 = arith.constant 31 : i32
    %39 = tpu.dynamic_rotate %34 by %c31_i32 dim 0 : vector<32x128xf32>, i32 -> vector<32x128xf32>
    %40 = vector.broadcast %24 : vector<32x1xf32> to vector<32x128xf32>
    %41 = arith.mulf %40, %39 : vector<32x128xf32>
    %42 = arith.addf %38, %41 : vector<32x128xf32>
    %c0_15 = arith.constant 0 : index
    %c0_16 = arith.constant 0 : index
    %43 = vector.load %arg3[%c0_15, %c0_16] : memref<1x128xf32, #tpu.memory_space<vmem>>, vector<1x128xf32>
    %44 = vector.broadcast %43 : vector<1x128xf32> to vector<32x128xf32>
    %45 = arith.addf %42, %44 : vector<32x128xf32>
    %cst_17 = arith.constant 0.000000e+00 : f32
    %46 = vector.broadcast %cst_17 : f32 to vector<32x128xf32>
    %47 = arith.maximumf %45, %46 : vector<32x128xf32>
    %48 = arith.truncf %47 : vector<32x128xf32> to vector<32x128xbf16>
    %c0_18 = arith.constant 0 : index
    %c0_19 = arith.constant 0 : index
    %c0_20 = arith.constant 0 : index
    %49 = vector.load %arg4[%c0_18, %c0_19, %c0_20] : memref<3x128x256xbf16, #tpu.memory_space<vmem>>, vector<1x128x256xbf16>
    %50 = vector.shape_cast %49 : vector<1x128x256xbf16> to vector<128x256xbf16>
    %cst_21 = arith.constant dense<0.000000e+00> : vector<32x256xf32>
    %51 = tpu.matmul %48, %50, %cst_21 {dimension_numbers = #tpu.dot_dimension_numbers<[1], [0], [0], [1], [0, 0, 1, 1], [], []>} : vector<32x128xbf16>, vector<128x256xbf16>, vector<32x256xf32> -> vector<32x256xf32>
    %c1_22 = arith.constant 1 : index
    %c0_23 = arith.constant 0 : index
    %c0_24 = arith.constant 0 : index
    %52 = vector.load %arg4[%c1_22, %c0_23, %c0_24] : memref<3x128x256xbf16, #tpu.memory_space<vmem>>, vector<1x128x256xbf16>
    %53 = vector.shape_cast %52 : vector<1x128x256xbf16> to vector<128x256xbf16>
    %cst_25 = arith.constant dense<0.000000e+00> : vector<32x256xf32>
    %54 = tpu.matmul %48, %53, %cst_25 {dimension_numbers = #tpu.dot_dimension_numbers<[1], [0], [0], [1], [0, 0, 1, 1], [], []>} : vector<32x128xbf16>, vector<128x256xbf16>, vector<32x256xf32> -> vector<32x256xf32>
    %c2_26 = arith.constant 2 : index
    %c0_27 = arith.constant 0 : index
    %c0_28 = arith.constant 0 : index
    %55 = vector.load %arg4[%c2_26, %c0_27, %c0_28] : memref<3x128x256xbf16, #tpu.memory_space<vmem>>, vector<1x128x256xbf16>
    %56 = vector.shape_cast %55 : vector<1x128x256xbf16> to vector<128x256xbf16>
    %cst_29 = arith.constant dense<0.000000e+00> : vector<32x256xf32>
    %57 = tpu.matmul %48, %56, %cst_29 {dimension_numbers = #tpu.dot_dimension_numbers<[1], [0], [0], [1], [0, 0, 1, 1], [], []>} : vector<32x128xbf16>, vector<128x256xbf16>, vector<32x256xf32> -> vector<32x256xf32>
    %c1_i32_30 = arith.constant 1 : i32
    %58 = tpu.dynamic_rotate %51 by %c1_i32_30 dim 0 : vector<32x256xf32>, i32 -> vector<32x256xf32>
    %59 = vector.broadcast %20 : vector<32x1xf32> to vector<32x256xf32>
    %60 = arith.mulf %59, %58 : vector<32x256xf32>
    %61 = arith.addf %54, %60 : vector<32x256xf32>
    %c31_i32_31 = arith.constant 31 : i32
    %62 = tpu.dynamic_rotate %57 by %c31_i32_31 dim 0 : vector<32x256xf32>, i32 -> vector<32x256xf32>
    %63 = vector.broadcast %24 : vector<32x1xf32> to vector<32x256xf32>
    %64 = arith.mulf %63, %62 : vector<32x256xf32>
    %65 = arith.addf %61, %64 : vector<32x256xf32>
    %c0_32 = arith.constant 0 : index
    %c0_33 = arith.constant 0 : index
    %66 = vector.load %arg5[%c0_32, %c0_33] : memref<1x256xf32, #tpu.memory_space<vmem>>, vector<1x256xf32>
    %67 = vector.broadcast %66 : vector<1x256xf32> to vector<32x256xf32>
    %68 = arith.addf %65, %67 : vector<32x256xf32>
    %cst_34 = arith.constant 0.000000e+00 : f32
    %69 = vector.broadcast %cst_34 : f32 to vector<32x256xf32>
    %70 = arith.maximumf %68, %69 : vector<32x256xf32>
    %c0_35 = arith.constant 0 : index
    %c0_36 = arith.constant 0 : index
    %71 = vector.load %arg6[%c0_35, %c0_36] : memref<32x256xf32, #tpu.memory_space<vmem>>, vector<32x256xf32>
    tpu.vector_store %arg6[%c0_35, %c0_36], %70 {strides = array<i32>} : memref<32x256xf32, #tpu.memory_space<vmem>>, vector<32x256xf32>,
    return
  }
  func.func @transform_0(%arg0: i32) -> (i32, i32) {
    %c0_i32 = arith.constant 0 : i32
    %c0_i32_0 = arith.constant 0 : i32
    return %arg0, %c0_i32 : i32, i32
  }
  func.func @transform_1(%arg0: i32) -> (i32, i32, i32) {
    %c0_i32 = arith.constant 0 : i32
    %c0_i32_0 = arith.constant 0 : i32
    %c0_i32_1 = arith.constant 0 : i32
    %c0_i32_2 = arith.constant 0 : i32
    return %c0_i32, %c0_i32_0, %c0_i32_1 : i32, i32, i32
  }
  func.func @transform_2(%arg0: i32) -> (i32, i32) {
    %c0_i32 = arith.constant 0 : i32
    %c0_i32_0 = arith.constant 0 : i32
    %c0_i32_1 = arith.constant 0 : i32
    return %c0_i32, %c0_i32_0 : i32, i32
  }
  func.func @transform_3(%arg0: i32) -> (i32, i32, i32) {
    %c0_i32 = arith.constant 0 : i32
    %c0_i32_0 = arith.constant 0 : i32
    %c0_i32_1 = arith.constant 0 : i32
    %c0_i32_2 = arith.constant 0 : i32
    return %c0_i32, %c0_i32_0, %c0_i32_1 : i32, i32, i32
  }
  func.func @transform_4(%arg0: i32) -> (i32, i32) {
    %c0_i32 = arith.constant 0 : i32
    %c0_i32_0 = arith.constant 0 : i32
    %c0_i32_1 = arith.constant 0 : i32
    return %c0_i32, %c0_i32_0 : i32, i32
  }
  func.func @transform_5(%arg0: i32) -> (i32, i32) {
    %c0_i32 = arith.constant 0 : i32
    %c0_i32_0 = arith.constant 0 : i32
    return %arg0, %c0_i32 : i32, i32
  }
}

</mosaic_0001>

<bundles_post_ra>
// kernel: tpu_custom_call.1
= control target key start
LH: loop header
LB: loop body
LE: loop exit
PB: predicated region body
PF: predicated region fallthrough
CT: control target
= control target key end

     0   :  { %10 = vsyncpa [#allocation3], 0  ;;  %s1524_s0 = inlined_call_operand.hbm [shape: bf16[32,64], index: 0, kind: input, shape index: {}]   ;;  %s1525_s1 = inlined_call_operand.hbm [shape: bf16[3,64,128], index: 1, kind: input, shape index: {}]   ;;  %s1526_s2 = inlined_call_operand.vmem [shape: f32[1,128], index: 2, kind: input, shape index: {}]   ;;  %s1527_s3 = inlined_call_operand.hbm [shape: bf16[3,128,256], index: 3, kind: input, shape index: {}]   ;;  %s1528_s4 = inlined_call_operand.vmem [shape: f32[1,256], index: 4, kind: input, shape index: {}]   ;;  %s1529_s5 = inlined_call_operand.hbm [shape: f32[32,256], index: 5, kind: output, shape index: {}]  }
   0x1   :  { %11 = vsyncpa [#allocation6], 0 }
   0x2   :  { %12 = vsyncpa [#allocation4], 0  ;;  %s1331_s18 = smov [#allocation5]   ;;  %s1332_s20 = smov [#allocation2]  }
   0x3   :  { %s30_s19 = sshll.u32 %s1331_s18, 4  ;;  %s18_s21 = sshll.u32 %s1332_s20, 4  ;;  %s31_s19 = int_to_ptr.vmem [resolvable:$true] %s30_s19  ;;  %s1373_s21 = int_to_ptr.vmem [resolvable:$true] %s18_s21 }
   0x4   :  { %s1237_s24 = scalar_lea.hbm %s1525_s1, 1536 }
   0x5   :  { %p1238_p0 = scmp.ne.s32.totalorder %s1525_s1, %s1237_s24  ;;  %p1241_p1 = scmp.lt.u32.totalorder %s1237_s24, %s1525_s1 }
   0x7   :  { %p1243_p2 = pnand %p1241_p1, %p1238_p0 }
   0x9   :  { %1246 = shalt.err (!%p1243_p2)
}
   0xa   :  { %s1247_s29 = scalar_lea.vmem %s31_s19, 1536  ;;  %p1252_p4 = scmp.lt.s32.totalorder %s31_s19, %s31_s19 }
   0xb   :  { %p1248_p3 = scmp.ne.s32.totalorder %s31_s19, %s1247_s29  ;;  %p1253_p5 = scmp.lt.s32.totalorder %s1247_s29, %s1247_s29 }
   0xd   :  { %p1254_p6 = por %p1253_p5, %p1252_p4 }
   0xf   :  { %p1255_p7 = pnand %p1254_p6, %p1248_p3 }
  0x11   :  { %1258 = shalt.err (!%p1255_p7)
}
  0x12   :  { %s1333_s30 = smov 64   ;;  %s1334_s6 = smov 4  }
  0x13   :  { %36 = dma.hbm_to_vmem [thread:$0]  %s1525_s1, 1536, %s31_s19, [#allocation6], %s1333_s30, %s1333_s30, %s1334_s6  }
  0x14   :  { %s1259_s11 = scalar_lea.hbm %s1524_s0, 256 }
  0x15   :  { %p1260_p8 = scmp.ne.s32.totalorder %s1524_s0, %s1259_s11  ;;  %p1263_p9 = scmp.lt.u32.totalorder %s1259_s11, %s1524_s0 }
  0x17   :  { %p1265_p10 = pnand %p1263_p9, %p1260_p8 }
  0x19   :  { %1268 = shalt.err (!%p1265_p10)
}
  0x1a   :  { %s1269_s16 = scalar_lea.vmem %s1373_s21, 256  ;;  %p1274_p12 = scmp.lt.s32.totalorder %s1373_s21, %s1373_s21 }
  0x1b   :  { %p1270_p11 = scmp.ne.s32.totalorder %s1373_s21, %s1269_s16  ;;  %p1275_p13 = scmp.lt.s32.totalorder %s1269_s16, %s1269_s16 }
  0x1d   :  { %p1276_p0 = por %p1275_p13, %p1274_p12 }
  0x1f   :  { %p1277_p1 = pnand %p1276_p0, %p1270_p11 }
  0x21   :  { %1280 = shalt.err (!%p1277_p1)
}
  0x22   :  { %24 = dma.hbm_to_vmem [thread:$0]  %s1524_s0, 256, %s1373_s21, [#allocation3], %s1333_s30, %s1333_s30, %s1334_s6  }
  0x23   :  { %s1335_s18 = smov [#allocation7]   ;;  %s1281_s23 = scalar_lea.hbm %s1527_s3, 6144 }
  0x24   :  { %s44_s19 = sshll.u32 %s1335_s18, 4  ;;  %p1282_p2 = scmp.ne.s32.totalorder %s1527_s3, %s1281_s23  ;;  %s45_s19 = int_to_ptr.vmem [resolvable:$true] %s44_s19 }
  0x25   :  { %p1285_p3 = scmp.lt.u32.totalorder %s1281_s23, %s1527_s3 }
  0x27   :  { %p1287_p4 = pnand %p1285_p3, %p1282_p2 }
  0x29   :  { %1290 = shalt.err (!%p1287_p4)
}
  0x2a   :  { %s1291_s28 = scalar_lea.vmem %s45_s19, 6144  ;;  %p1296_p6 = scmp.lt.s32.totalorder %s45_s19, %s45_s19 }
  0x2b   :  { %p1292_p5 = scmp.ne.s32.totalorder %s45_s19, %s1291_s28  ;;  %p1297_p7 = scmp.lt.s32.totalorder %s1291_s28, %s1291_s28 }
  0x2d   :  { %p1298_p8 = por %p1297_p7, %p1296_p6 }
  0x2f   :  { %p1299_p9 = pnand %p1298_p8, %p1292_p5 }
  0x31   :  { %1302 = shalt.err (!%p1299_p9)
}
  0x32   :  { %s1336_s0 = smov 128   ;;  %s1337_s21 = smov 8  }
  0x33   :  { %50 = dma.hbm_to_vmem [thread:$0]  %s1527_s3, 6144, %s45_s19, [#allocation6], %s1336_s0, %s1336_s0, %s1337_s21  }
  0x34   :  { %1325 = dma.done.wait [#allocation3], 256  }
  0x35   :  { %1326 = vsyncadd [#allocation3], 4294967040 }
  0x36   :  { %1327 = dma.done.wait [#allocation6], 7680  }
  0x37   :  { %1328 = vsyncadd [#allocation6], 4294959616  ;;  %v1151_v0 = vld [vmem:[#allocation5] sm:$0xff]   ;;  %v1152_v1 = vld [vmem:[#allocation5 + $0x8] sm:$0xff]   ;;  %vm186_vm0 = vcmask 523264   ;;  %v1338_v47 = vmov 0   ;;  %v63_v48 = vlaneseq }
  0x38   :  { %1103 = vmatprep.subr.bf16.mxu0 %v1151_v0  ;;  %v1154_v2 = vld [vmem:[#allocation5 + $0x40] sm:$0xff]   ;;  %v1153_v3 = vld [vmem:[#allocation5 + $0x10] sm:$0xff]   ;;  %v1156_v4 = vld [vmem:[#allocation5 + $0x48] sm:$0xff]  }
  0x39   :  { %1104 = vmatpush3.bf16.msra.mxu0 %v1151_v0  ;;  %1115 = vmatprep.subr.bf16.mxu1 %v1154_v2  ;;  %v1157_v5 = vld [vmem:[#allocation2] sm:$0xff]   ;;  %v1155_v6 = vld [vmem:[#allocation5 + $0x18] sm:$0xff]   ;;  %v1159_v9 = vld [vmem:[#allocation5 + $0x20] sm:$0xff]   ;;  %v1424_v49 = vshrl.u32 %v63_v48, 7 }
  0x3a   :  { %1105 = vmatprep.subr.bf16.mxu0 %v1152_v1  ;;  %1116 = vmatpush3.bf16.msra.mxu1 %v1154_v2  ;;  %v1160_v7 = vld [vmem:[#allocation5 + $0x50] sm:$0xff]   ;;  %v1162_v8 = vld [vmem:[#allocation5 + $0x58] sm:$0xff]   ;;  %v1161_v11 = vld [vmem:[#allocation5 + $0x28] sm:$0xff]  }
  0x3b   :  { %1117 = vmatprep.subr.bf16.mxu1 %v1156_v4  ;;  %1111 = vmatprep.mubr.msk.bf16.mxu0 %vm186_vm0, %v1157_v5  ;;  %v1158_v10 = vld [vmem:[#allocation2 + $0x8] sm:$0xff]   ;;  %v1165_v12 = vld [vmem:[#allocation7] ss:$8 sps:$4 sm:$0xff]   ;;  %v1167_v13 = vld [vmem:[#allocation7 + $0x4] ss:$8 sps:$4 sm:$0xff]   ;;  %v66_v51 = vadd.s32 16, %v1424_v49 }
  0x3c   :  { %1123 = vmatprep.mubr.msk.bf16.mxu1 %vm186_vm0, %v1157_v5  ;;  %v1163_v14 = vld [vmem:[#allocation5 + $0x30] sm:$0xff]   ;;  %v1164_v15 = vld [vmem:[#allocation5 + $0x38] sm:$0xff]   ;;  %v1170_v16 = vld [vmem:[#allocation7 + $0x104] ss:$8 sps:$4 sm:$0xff]   ;;  %vm337_vm1 = vcmp.lt.s32.totalorder %v1424_v49, 1  ;;  %v72_v59 = vand.u32 15, %v1424_v49 }
  0x3d   :  { %1106 = vmatpush3.bf16.msra.mxu0 %v1152_v1  ;;  %v1168_v17 = vld [vmem:[#allocation7 + $0x100] ss:$8 sps:$4 sm:$0xff]   ;;  %v1173_v18 = vld [vmem:[#allocation7 + $0x14] ss:$8 sps:$4 sm:$0xff]   ;;  %v1171_v19 = vld [vmem:[#allocation7 + $0x10] ss:$8 sps:$4 sm:$0xff]  }
  0x3e   :  { %1107 = vmatprep.subr.bf16.mxu0 %v1153_v3  ;;  %1118 = vmatpush3.bf16.msra.mxu1 %v1156_v4  ;;  %v1176_v20 = vld [vmem:[#allocation7 + $0x114] ss:$8 sps:$4 sm:$0xff]   ;;  %v1174_v21 = vld [vmem:[#allocation7 + $0x110] ss:$8 sps:$4 sm:$0xff]   ;;  %v1179_v22 = vld [vmem:[#allocation7 + $0x24] ss:$8 sps:$4 sm:$0xff]  }
  0x3f   :  { %1119 = vmatprep.subr.bf16.mxu1 %v1160_v7  ;;  %v1177_v23 = vld [vmem:[#allocation7 + $0x20] ss:$8 sps:$4 sm:$0xff]   ;;  %v1182_v25 = vld [vmem:[#allocation7 + $0x124] ss:$8 sps:$4 sm:$0xff]   ;;  %v1185_v26 = vld [vmem:[#allocation7 + $0x34] ss:$8 sps:$4 sm:$0xff]  }
  0x40   :  { %v1180_v24 = vld [vmem:[#allocation7 + $0x120] ss:$8 sps:$4 sm:$0xff]   ;;  %v1183_v27 = vld [vmem:[#allocation7 + $0x30] ss:$8 sps:$4 sm:$0xff]   ;;  %v1188_v28 = vld [vmem:[#allocation7 + $0x134] ss:$8 sps:$4 sm:$0xff]  }
  0x41   :  { %1108 = vmatpush3.bf16.msra.mxu0 %v1153_v3  ;;  %v1186_v29 = vld [vmem:[#allocation7 + $0x130] ss:$8 sps:$4 sm:$0xff]   ;;  %v1191_v30 = vld [vmem:[#allocation7 + $0x44] ss:$8 sps:$4 sm:$0xff]   ;;  %v1189_v31 = vld [vmem:[#allocation7 + $0x40] ss:$8 sps:$4 sm:$0xff]  }
  0x42   :  { %1109 = vmatprep.subr.bf16.mxu0 %v1155_v6  ;;  %1120 = vmatpush3.bf16.msra.mxu1 %v1160_v7  ;;  %v1194_v32 = vld [vmem:[#allocation7 + $0x144] ss:$8 sps:$4 sm:$0xff]   ;;  %v1192_v33 = vld [vmem:[#allocation7 + $0x140] ss:$8 sps:$4 sm:$0xff]   ;;  %v1197_v34 = vld [vmem:[#allocation7 + $0x54] ss:$8 sps:$4 sm:$0xff]  }
  0x43   :  { %1121 = vmatprep.subr.bf16.mxu1 %v1162_v8  ;;  %v1195_v35 = vld [vmem:[#allocation7 + $0x50] ss:$8 sps:$4 sm:$0xff]   ;;  %v1200_v36 = vld [vmem:[#allocation7 + $0x154] ss:$8 sps:$4 sm:$0xff]   ;;  %v1203_v38 = vld [vmem:[#allocation7 + $0x64] ss:$8 sps:$4 sm:$0xff]  }
  0x44   :  { %v1198_v37 = vld [vmem:[#allocation7 + $0x150] ss:$8 sps:$4 sm:$0xff]   ;;  %v1201_v39 = vld [vmem:[#allocation7 + $0x60] ss:$8 sps:$4 sm:$0xff]   ;;  %v1206_v40 = vld [vmem:[#allocation7 + $0x164] ss:$8 sps:$4 sm:$0xff]  }
  0x45   :  { %1110 = vmatpush3.bf16.msra.mxu0 %v1155_v6  ;;  %v1204_v41 = vld [vmem:[#allocation7 + $0x160] ss:$8 sps:$4 sm:$0xff]   ;;  %v1209_v42 = vld [vmem:[#allocation7 + $0x74] ss:$8 sps:$4 sm:$0xff]   ;;  %v1207_v43 = vld [vmem:[#allocation7 + $0x70] ss:$8 sps:$4 sm:$0xff]  }
  0x46   :  { %1127 = vmatprep.subr.bf16.mxu0 %v1159_v9  ;;  %1122 = vmatpush3.bf16.msra.mxu1 %v1162_v8  ;;  %v1212_v44 = vld [vmem:[#allocation7 + $0x174] ss:$8 sps:$4 sm:$0xff]   ;;  %v1210_v45 = vld [vmem:[#allocation7 + $0x170] ss:$8 sps:$4 sm:$0xff]   ;;  %v1215_v46 = vld [vmem:[#allocation7 + $0x84] ss:$8 sps:$4 sm:$0xff]  }
  0x47   :  { %549 = vmatprep.subr.bf16.mxu1 %v1167_v13  ;;  %vm423_vm2 = vcmp.lt.s32.totalorder %v1424_v49, 7  ;;  %v86_v63 = vand.u32 15, %v66_v51  ;;  %v67_v3 = vadd.s32 24, %v1424_v49  ;;  %v65_v8 = vadd.s32 8, %v1424_v49  ;;  %v1213_v48 = vld [vmem:[#allocation7 + $0x80] ss:$8 sps:$4 sm:$0xff]  }
  0x48   :  { %1112 = vmatmul.mubr.msk.bf16.vlgmr.msra.gmra.mrb[0].mxu0 %vm186_vm0, %v1158_v10  ;;  %vm116_vm4 = vcmp.ne.s32.totalorder %v72_v59, 0  ;;  %v1225_v59 = vld [vmem:[#allocation7 + $0xc0] ss:$8 sps:$4 sm:$0xff]  }
  0x49   :  { %1128 = vmatpush3.bf16.msra.mxu0 %v1159_v9  ;;  %1135 = vmatprep.mubr.msk.bf16.mxu0 %vm186_vm0, %v1157_v5  ;;  %vm118_vm3 = vcmp.ne.s32.totalorder %v86_v63, 0  ;;  %v1231_v63 = vld [vmem:[#allocation7 + $0xe0] ss:$8 sps:$4 sm:$0xff]  }
  0x4a   :  { %1129 = vmatprep.subr.bf16.mxu0 %v1161_v11  ;;  %1124 = vmatmul.mubr.msk.bf16.vlgmr.msra.gmra.mrb[0].mxu1 %vm186_vm0, %v1158_v10 }
  0x4b   :  { %550 = vmatpush1.bf16.msra.mxu1 %v1165_v12  ;;  %581 = vmatprep.mubr.bf16.mxu1 %v1338_v47 }
  0x4c   :  { %551 = vmatprep.subr.bf16.mxu1 %v1173_v18 }
  0x4d   :  { %1130 = vmatpush3.bf16.msra.mxu0 %v1161_v11 }
  0x4e   :  { %1131 = vmatprep.subr.bf16.mxu0 %v1163_v14 }
  0x4f   :  { %552 = vmatpush1.bf16.msra.mxu1 %v1171_v19 }
  0x50   :  { %553 = vmatprep.subr.bf16.mxu1 %v1179_v22 }
  0x51   :  { %1132 = vmatpush3.bf16.msra.mxu0 %v1163_v14 }
  0x52   :  { %1133 = vmatprep.subr.bf16.mxu0 %v1164_v15 }
  0x53   :  { %554 = vmatpush1.bf16.msra.mxu1 %v1177_v23 }
  0x54   :  { %555 = vmatprep.subr.bf16.mxu1 %v1185_v26 }
  0x55   :  { %1134 = vmatpush3.bf16.msra.mxu0 %v1164_v15  ;;  %v93_v15 = vand.u32 15, %v67_v3 }
  0x56   :  { %716 = vmatprep.subr.bf16.mxu0 %v1170_v16  ;;  %v79_v16 = vand.u32 15, %v65_v8 }
  0x57   :  { %556 = vmatpush1.bf16.msra.mxu1 %v1183_v27  ;;  %vm131_vm5 = vcmp.ne.s32.totalorder %v93_v15, 15  ;;  %v1036_v27 = vld [vmem:[%s1526_s2] ss:$0 sm:$0xff] }
  0x58   :  { %1136 = vmatmul.mubr.msk.bf16.vlgmr.msra.gmra.mrb[4].mxu0 %vm186_vm0, %v1158_v10  ;;  %557 = vmatprep.subr.bf16.mxu1 %v1191_v30  ;;  %vm129_vm6 = vcmp.ne.s32.totalorder %v79_v16, 15 }
  0x59   :  { %717 = vmatpush1.bf16.msra.mxu0 %v1168_v17  ;;  %748 = vmatprep.mubr.bf16.mxu0 %v1338_v47  ;;  %v1339_v17 = vmov 0.0  }
  0x5a   :  { %718 = vmatprep.subr.bf16.mxu0 %v1176_v20  ;;  %v1448_v18 = vsel %vm118_vm3, 1.0, %v1339_v17  ;;  %v1450_v19 = vsel %vm116_vm4, 1.0, %v1339_v17  ;;  %v1454_v23 = vsel %vm131_vm5, 1.0, %v1339_v17  ;;  %v1456_v26 = vsel %vm129_vm6, 1.0, %v1339_v17 }
  0x5b   :  { %558 = vmatpush1.bf16.msra.mxu1 %v1189_v31 }
  0x5c   :  { %559 = vmatprep.subr.bf16.mxu1 %v1197_v34 }
  0x5d   :  { %719 = vmatpush1.bf16.msra.mxu0 %v1174_v21 }
  0x5e   :  { %720 = vmatprep.subr.bf16.mxu0 %v1182_v25 }
  0x5f   :  { %560 = vmatpush1.bf16.msra.mxu1 %v1195_v35 }
  0x60   :  { %561 = vmatprep.subr.bf16.mxu1 %v1203_v38 }
  0x61   :  { %721 = vmatpush1.bf16.msra.mxu0 %v1180_v24 }
  0x62   :  { %722 = vmatprep.subr.bf16.mxu0 %v1188_v28 }
  0x63   :  { %562 = vmatpush1.bf16.msra.mxu1 %v1201_v39 }
  0x64   :  { %563 = vmatprep.subr.bf16.mxu1 %v1209_v42 }
  0x65   :  { %723 = vmatpush1.bf16.msra.mxu0 %v1186_v29 }
  0x66   :  { %724 = vmatprep.subr.bf16.mxu0 %v1194_v32 }
  0x67   :  { %564 = vmatpush1.bf16.msra.mxu1 %v1207_v43 }
  0x68   :  { %873 = vmatprep.subr.bf16.mxu1 %v1215_v46 }
  0x69   :  { %725 = vmatpush1.bf16.msra.mxu0 %v1192_v33 }
  0x6a   :  { %726 = vmatprep.subr.bf16.mxu0 %v1200_v36 }
  0x6d   :  { %727 = vmatpush1.bf16.msra.mxu0 %v1198_v37 }
  0x6e   :  { %728 = vmatprep.subr.bf16.mxu0 %v1206_v40 }
  0x71   :  { %729 = vmatpush1.bf16.msra.mxu0 %v1204_v41 }
  0x72   :  { %730 = vmatprep.subr.bf16.mxu0 %v1212_v44 }
  0x75   :  { %731 = vmatpush1.bf16.msra.mxu0 %v1210_v45 }
 0x11b   :  { %v1113_v50 = vpop.f32.mrb[0].mxu0 }
 0x11c   :  { %v335_v52 = vrot.slane %v1113_v50, 7  ;;  %v227_v53 = vpop.f32.mrb[1].mxu0 }
 0x11d   :  { %v333_v54 = vrot.slane %v227_v53, 7  ;;  %v1114_v55 = vpop.f32.mrb[2].mxu0  ;;  %v1125_v58 = vpop.f32.mrb[0].mxu1  ;;  %v1216_v53 = vld [vmem:[#allocation7 + $0x90] ss:$8 sps:$4 sm:$0xff]  }
 0x11e   :  { %v336_v56 = vrot.slane %v1114_v55, 7  ;;  %v230_v57 = vpop.f32.mrb[3].mxu0  ;;  %v421_v61 = vrot.slane %v1125_v58, 1  ;;  %v318_v62 = vpop.f32.mrb[1].mxu1  ;;  %v1219_v55 = vld [vmem:[#allocation7 + $0xa0] ss:$8 sps:$4 sm:$0xff]  }
 0x11f   :  { %v334_v60 = vrot.slane %v230_v57, 7  ;;  %v419_v0 = vrot.slane %v318_v62, 1  ;;  %v1126_v1 = vpop.f32.mrb[2].mxu1  ;;  %v1222_v57 = vld [vmem:[#allocation7 + $0xb0] ss:$8 sps:$4 sm:$0xff]  }
 0x120   :  { %v341_v2 = vsel %vm337_vm1, %v336_v56, %v333_v54  ;;  %v338_v4 = vsel %vm337_vm1, %v335_v52, %v336_v56  ;;  %v422_v5 = vrot.slane %v1126_v1, 1  ;;  %v321_v6 = vpop.f32.mrb[3].mxu1  ;;  %v1224_v56 = vld [vmem:[#allocation7 + $0xb4] ss:$8 sps:$4 sm:$0xff]   ;;  %v1227_v58 = vld [vmem:[#allocation7 + $0xc4] ss:$8 sps:$4 sm:$0xff]  }
 0x121   :  { %v339_v7 = vsel %vm337_vm1, %v334_v60, %v335_v52  ;;  %v340_v9 = vsel %vm337_vm1, %v333_v54, %v334_v60  ;;  %v420_v10 = vrot.slane %v321_v6, 1  ;;  %v342_v22 = vmul.f32 %v1450_v19, %v341_v2  ;;  %v1218_v52 = vld [vmem:[#allocation7 + $0x94] ss:$8 sps:$4 sm:$0xff]   ;;  %v1221_v54 = vld [vmem:[#allocation7 + $0xa4] ss:$8 sps:$4 sm:$0xff]  }
 0x122   :  { %v427_v11 = vsel %vm423_vm2, %v422_v5, %v419_v0  ;;  %v424_v12 = vsel %vm423_vm2, %v421_v61, %v422_v5  ;;  %v344_v20 = vmul.f32 %v1448_v18, %v339_v7  ;;  %v1230_v60 = vld [vmem:[#allocation7 + $0xd4] ss:$8 sps:$4 sm:$0xff]   ;;  %v1233_v62 = vld [vmem:[#allocation7 + $0xe4] ss:$8 sps:$4 sm:$0xff]   ;;  %v1234_v1 = vld [vmem:[#allocation7 + $0xf0] ss:$8 sps:$4 sm:$0xff]  }
 0x123   :  { %v425_v13 = vsel %vm423_vm2, %v420_v10, %v421_v61  ;;  %v426_v14 = vsel %vm423_vm2, %v419_v0, %v420_v10  ;;  %v431_v32 = vmul.f32 %v1454_v23, %v427_v11  ;;  %v1228_v61 = vld [vmem:[#allocation7 + $0xd0] ss:$8 sps:$4 sm:$0xff]   ;;  %v1236_v0 = vld [vmem:[#allocation7 + $0xf4] ss:$8 sps:$4 sm:$0xff]  }
 0x124   :  { %v429_v36 = vmul.f32 %v1456_v26, %v425_v13 }
 0x12b   :  { %v1137_v21 = vpop.f32.mrb[4].mxu0 }
 0x12c   :  { %v413_v24 = vadd.f32 %v1137_v21, %v344_v20  ;;  %v404_v25 = vpop.f32.mrb[5].mxu0 }
 0x12d   :  { %v405_v28 = vadd.f32 %v404_v25, %v342_v22  ;;  %v1138_v29 = vpop.f32.mrb[6].mxu0 }
 0x12e   :  { %v434_v30 = vadd.f32 %v424_v12, %v413_v24  ;;  %v416_v31 = vadd.f32 %v1138_v29, %v338_v4  ;;  %v407_v33 = vpop.f32.mrb[7].mxu0 }
 0x12f   :  { %v432_v34 = vadd.f32 %v426_v14, %v405_v28  ;;  %v408_v35 = vadd.f32 %v407_v33, %v340_v9 }
 0x130   :  { %v445_v37 = vadd.f32 %v1036_v27, %v434_v30  ;;  %v435_v38 = vadd.f32 %v431_v32, %v416_v31 }
 0x131   :  { %v443_v39 = vadd.f32 %v1036_v27, %v432_v34  ;;  %v433_v40 = vadd.f32 %v429_v36, %v408_v35 }
 0x132   :  { %v446_v41 = vadd.f32 %v1036_v27, %v435_v38  ;;  %v449_v43 = vmax.f32 %v445_v37, 0.0 }
 0x133   :  { %v444_v42 = vadd.f32 %v1036_v27, %v433_v40  ;;  %v447_v45 = vmax.f32 %v443_v39, 0.0 }
 0x134   :  { %v450_v44 = vmax.f32 %v446_v41, 0.0 }
 0x135   :  { %v448_v46 = vmax.f32 %v444_v42, 0.0 }
 0x136   :  { %v452_v50 = vpack.c.bf16 %v450_v44, %v449_v43 }
 0x137   :  { %v451_v51 = vpack.c.bf16 %v448_v46, %v447_v45 }
 0x139   :  { %582 = vmatmul.mubr.bf16.vlgmr.msra.gmra.mrb[4].mxu1 %v451_v51  ;;  %749 = vmatmul.mubr.bf16.vlgmr.msra.gmra.mrb[8].mxu0 %v451_v51 }
 0x13a   :  { %874 = vmatpush1.bf16.msra.mxu1 %v1213_v48  ;;  %591 = vmatprep.mubr.bf16.mxu1 %v1338_v47 }
 0x13b   :  { %875 = vmatprep.subr.bf16.mxu1 %v1218_v52  ;;  %758 = vmatprep.mubr.bf16.mxu0 %v1338_v47 }
 0x13e   :  { %876 = vmatpush1.bf16.msra.mxu1 %v1216_v53 }
 0x13f   :  { %877 = vmatprep.subr.bf16.mxu1 %v1221_v54 }
 0x141   :  { %592 = vmatmul.mubr.bf16.gmra.mrb[8].mxu1 %v452_v50  ;;  %759 = vmatmul.mubr.bf16.gmra.mrb[12].mxu0 %v452_v50 }
 0x142   :  { %878 = vmatpush1.bf16.msra.mxu1 %v1219_v55  ;;  %905 = vmatprep.mubr.bf16.mxu1 %v1338_v47  ;;  %v962_v55 = vsub.s32 0, %v1424_v49 }
 0x143   :  { %879 = vmatprep.subr.bf16.mxu1 %v1224_v56  ;;  %v958_v56 = vld [vmem:[%s1528_s4] sm:$0x3]  ;;  %s1340_s4 = smov [#allocation8]  }
 0x144   :  { %s999_s8 = sshll.u32 %s1340_s4, 4  ;;  %s1000_s8 = int_to_ptr.vmem [resolvable:$true] %s999_s8 }
 0x145   :  { %s1303_s9 = scalar_lea.vmem %s1000_s8, 1024  ;;  %p1308_p11 = scmp.lt.s32.totalorder %s1000_s8, %s1000_s8 }
 0x146   :  { %880 = vmatpush1.bf16.msra.mxu1 %v1222_v57  ;;  %v966_v57 = vsub.s32 1, %v1424_v49  ;;  %p1304_p10 = scmp.ne.s32.totalorder %s1000_s8, %s1303_s9  ;;  %p1309_p12 = scmp.lt.s32.totalorder %s1303_s9, %s1303_s9 }
 0x147   :  { %881 = vmatprep.subr.bf16.mxu1 %v1227_v58 }
 0x148   :  { %p1310_p13 = por %p1309_p12, %p1308_p11 }
 0x14a   :  { %882 = vmatpush1.bf16.msra.mxu1 %v1225_v59  ;;  %p1311_p0 = pnand %p1310_p13, %p1304_p10 }
 0x14b   :  { %883 = vmatprep.subr.bf16.mxu1 %v1230_v60 }
 0x14e   :  { %884 = vmatpush1.bf16.msra.mxu1 %v1228_v61 }
 0x14f   :  { %885 = vmatprep.subr.bf16.mxu1 %v1233_v62  ;;  %v963_v62 = vrot.slane %v958_v56, %v962_v55 }
 0x152   :  { %886 = vmatpush1.bf16.msra.mxu1 %v1231_v63 }
 0x153   :  { %887 = vmatprep.subr.bf16.mxu1 %v1236_v0 }
 0x156   :  { %888 = vmatpush1.bf16.msra.mxu1 %v1234_v1  ;;  %v967_v1 = vrot.slane %v958_v56, %v966_v57 }
 0x159   :  { %906 = vmatmul.mubr.bf16.vlgmr.msra.gmra.mrb[12].mxu1 %v451_v51 }
 0x15a   :  { %915 = vmatprep.mubr.bf16.mxu1 %v1338_v47 }
 0x161   :  { %916 = vmatmul.mubr.bf16.gmra.mrb[16].mxu1 %v452_v50 }
 0x20c   :  { %v583_v2 = vpop.f32.mrb[4].mxu1  ;;  %v750_v3 = vpop.f32.mrb[8].mxu0 }
 0x20d   :  { %v585_v4 = vpop.f32.mrb[5].mxu1  ;;  %v752_v5 = vpop.f32.mrb[9].mxu0  ;;  %v769_v8 = vrot.slane %v583_v2, 7  ;;  %v926_v9 = vrot.slane %v750_v3, 1 }
 0x20e   :  { %v587_v6 = vpop.f32.mrb[6].mxu1  ;;  %v754_v7 = vpop.f32.mrb[10].mxu0  ;;  %v770_v14 = vrot.slane %v585_v4, 7  ;;  %v927_v15 = vrot.slane %v752_v5, 1 }
 0x20f   :  { %v771_v10 = vrot.slane %v587_v6, 7  ;;  %v928_v11 = vrot.slane %v754_v7, 1  ;;  %v589_v12 = vpop.f32.mrb[7].mxu1  ;;  %v756_v13 = vpop.f32.mrb[11].mxu0 }
 0x210   :  { %v772_v16 = vrot.slane %v589_v12, 7  ;;  %v929_v17 = vrot.slane %v756_v13, 1 }
 0x211   :  { %v938_v47 = vsel %vm423_vm2, %v926_v9, %v928_v11  ;;  %v781_v20 = vsel %vm337_vm1, %v769_v8, %v771_v10 }
 0x212   :  { %v939_v21 = vsel %vm423_vm2, %v927_v15, %v929_v17  ;;  %v782_v22 = vsel %vm337_vm1, %v770_v14, %v772_v16 }
 0x214   :  { %v593_v24 = vpop.f32.mrb[8].mxu1  ;;  %v760_v25 = vpop.f32.mrb[12].mxu0 }
 0x215   :  { %v773_v27 = vrot.slane %v593_v24, 7  ;;  %v930_v28 = vrot.slane %v760_v25, 1  ;;  %v595_v29 = vpop.f32.mrb[9].mxu1  ;;  %v762_v30 = vpop.f32.mrb[13].mxu0 }
 0x216   :  { %v774_v31 = vrot.slane %v595_v29, 7  ;;  %v931_v32 = vrot.slane %v762_v30, 1  ;;  %v597_v33 = vpop.f32.mrb[10].mxu1  ;;  %v764_v34 = vpop.f32.mrb[14].mxu0 }
 0x217   :  { %v936_v35 = vsel %vm423_vm2, %v928_v11, %v930_v28  ;;  %v775_v36 = vrot.slane %v597_v33, 7  ;;  %v932_v37 = vrot.slane %v764_v34, 1  ;;  %v599_v38 = vpop.f32.mrb[11].mxu1  ;;  %v766_v39 = vpop.f32.mrb[15].mxu0  ;;  %v779_v40 = vsel %vm337_vm1, %v771_v10, %v773_v27 }
 0x218   :  { %v937_v41 = vsel %vm423_vm2, %v929_v17, %v931_v32  ;;  %v776_v42 = vrot.slane %v599_v38, 7  ;;  %v933_v43 = vrot.slane %v766_v39, 1  ;;  %v780_v51 = vsel %vm337_vm1, %v772_v16, %v774_v31 }
 0x219   :  { %v940_v44 = vsel %vm423_vm2, %v932_v37, %v926_v9  ;;  %v783_v45 = vsel %vm337_vm1, %v775_v36, %v769_v8  ;;  %v934_v50 = vsel %vm423_vm2, %v930_v28, %v932_v37  ;;  %v777_v53 = vsel %vm337_vm1, %v773_v27, %v775_v36 }
 0x21a   :  { %v941_v46 = vsel %vm423_vm2, %v933_v43, %v927_v15  ;;  %v784_v48 = vsel %vm337_vm1, %v776_v42, %v770_v14  ;;  %v935_v52 = vsel %vm423_vm2, %v931_v32, %v933_v43  ;;  %v778_v54 = vsel %vm337_vm1, %v774_v31, %v776_v42 }
 0x21b   :  { %v785_v58 = vmul.f32 %v1450_v19, %v783_v45  ;;  %v786_v60 = vmul.f32 %v1450_v19, %v784_v48  ;;  %v944_v5 = vmul.f32 %v1456_v26, %v936_v35  ;;  %v945_v49 = vmul.f32 %v1456_v26, %v937_v41 }
 0x21c   :  { %v789_v14 = vmul.f32 %v1448_v18, %v779_v40  ;;  %v948_v29 = vmul.f32 %v1454_v23, %v940_v44  ;;  %v949_v33 = vmul.f32 %v1454_v23, %v941_v46 }
 0x22c   :  { %v907_v59 = vpop.f32.mrb[12].mxu1 }
 0x22d   :  { %v908_v61 = vadd.f32 %v907_v59, %v785_v58  ;;  %v909_v63 = vpop.f32.mrb[13].mxu1 }
 0x22e   :  { %v910_v0 = vadd.f32 %v909_v63, %v786_v60  ;;  %v911_v2 = vpop.f32.mrb[14].mxu1 }
 0x22f   :  { %v950_v3 = vadd.f32 %v938_v47, %v908_v61  ;;  %v912_v4 = vadd.f32 %v911_v2, %v781_v20  ;;  %v913_v6 = vpop.f32.mrb[15].mxu1  ;;  %v790_v47 = vmul.f32 %v1448_v18, %v780_v51 }
 0x230   :  { %v951_v7 = vadd.f32 %v939_v21, %v910_v0  ;;  %v914_v8 = vadd.f32 %v913_v6, %v782_v22 }
 0x231   :  { %v970_v9 = vadd.f32 %v963_v62, %v950_v3  ;;  %v952_v10 = vadd.f32 %v944_v5, %v912_v4 }
 0x232   :  { %v971_v11 = vadd.f32 %v967_v1, %v951_v7  ;;  %v953_v12 = vadd.f32 %v945_v49, %v914_v8 }
 0x233   :  { %v978_v19 = vmax.f32 %v970_v9, 0.0  ;;  %v972_v13 = vadd.f32 %v963_v62, %v952_v10 }
 0x234   :  { %v979_v15 = vmax.f32 %v971_v11, 0.0  ;;  %v973_v16 = vadd.f32 %v967_v1, %v953_v12  ;;  %v917_v17 = vpop.f32.mrb[16].mxu1 }
 0x235   :  { %986 = vst [vmem:[#allocation8] sm:$0xff] %v978_v19  ;;  %v980_v20 = vmax.f32 %v972_v13, 0.0  ;;  %v918_v24 = vadd.f32 %v917_v17, %v789_v14  ;;  %v919_v21 = vpop.f32.mrb[17].mxu1 }
 0x236   :  { %987 = vst [vmem:[#allocation8 + $0x8] sm:$0xff] %v979_v15  ;;  %v981_v22 = vmax.f32 %v973_v16, 0.0  ;;  %v920_v26 = vadd.f32 %v919_v21, %v790_v47  ;;  %v921_v25 = vpop.f32.mrb[18].mxu1 }
 0x237   :  { %988 = vst [vmem:[#allocation8 + $0x10] sm:$0xff] %v980_v20  ;;  %v954_v27 = vadd.f32 %v934_v50, %v918_v24  ;;  %v922_v28 = vadd.f32 %v921_v25, %v777_v53  ;;  %v923_v30 = vpop.f32.mrb[19].mxu1 }
 0x238   :  { %989 = vst [vmem:[#allocation8 + $0x18] sm:$0xff] %v981_v22  ;;  %v955_v31 = vadd.f32 %v935_v52, %v920_v26  ;;  %v924_v32 = vadd.f32 %v923_v30, %v778_v54 }
 0x239   :  { %v974_v18 = vadd.f32 %v963_v62, %v954_v27  ;;  %v956_v34 = vadd.f32 %v948_v29, %v922_v28 }
 0x23a   :  { %v975_v35 = vadd.f32 %v967_v1, %v955_v31  ;;  %v957_v36 = vadd.f32 %v949_v33, %v924_v32 }
 0x23b   :  { %v982_v37 = vmax.f32 %v974_v18, 0.0  ;;  %v976_v38 = vadd.f32 %v963_v62, %v956_v34 }
 0x23c   :  { %v983_v39 = vmax.f32 %v975_v35, 0.0  ;;  %v977_v40 = vadd.f32 %v967_v1, %v957_v36 }
 0x23d   :  { %990 = vst [vmem:[#allocation8 + $0x20] sm:$0xff] %v982_v37  ;;  %v984_v41 = vmax.f32 %v976_v38, 0.0 }
 0x23e   :  { %991 = vst [vmem:[#allocation8 + $0x28] sm:$0xff] %v983_v39  ;;  %v985_v42 = vmax.f32 %v977_v40, 0.0 }
 0x23f   :  { %992 = vst [vmem:[#allocation8 + $0x30] sm:$0xff] %v984_v41 }
 0x240   :  { %993 = vst [vmem:[#allocation8 + $0x38] sm:$0xff] %v985_v42 }
 0x241   :  { %1314 = shalt.err (!%p1311_p0)
}
 0x242   :  { %s1315_s12 = scalar_lea.hbm %s1529_s5, 1024 }
 0x243   :  { %p1316_p1 = scmp.ne.s32.totalorder %s1529_s5, %s1315_s12  ;;  %p1319_p2 = scmp.lt.u32.totalorder %s1315_s12, %s1529_s5 }
 0x245   :  { %p1321_p3 = pnand %p1319_p2, %p1316_p1 }
 0x247   :  { %1324 = shalt.err (!%p1321_p3)
}
 0x248   :  { %s1341_s1 = smov 256   ;;  %s1342_s17 = smov 16  }
 0x249   :  { %1005 = dma.vmem_to_hbm [thread:$0]  %s1000_s8, 1024, %s1529_s5, [#allocation4], %s1341_s1, %s1341_s1, %s1342_s17  }
 0x24a   :  { %1329 = dma.done.wait [#allocation4], 1024  }
 0x24b   :  { %1330 = vsyncadd [#allocation4], 4294966272 }
 0x24c   :  { %1009 = vsyncpa [#allocation3], 1 }
 0x24d   :  { %1010 = vsyncpa [#allocation6], 1 }
 0x24e   :  { %1011 = vsyncpa [#allocation4], 1 }

</bundles_post_ra>
